<compile_context>
chip_gen: v7x
topology: tpu7x:2x2x1
jax: 0.10.0
libtpu: 0.0.40
codegen_flags: <defaults>
</compile_context>

<pallas_src>
import functools

import jax
import jax.numpy as jnp
from jax.experimental import pallas as pl
from jax.experimental.pallas import tpu as pltpu


def conv_stats_kernel(x_ref, w_ref, conv_ref, stats_ref, *, h_tile, w_out, cin3, cout):
    """One (batch, h-tile) block: 3x3 conv as 3 accumulated (rows x 3*Cin) MXU matmuls
    (dx pre-packed along lanes by the wrapper) + partial BN stats for this tile."""
    t = pl.program_id(1)
    row0 = t * h_tile
    rows = h_tile * w_out

    acc = jnp.zeros((rows, cout), jnp.float32)
    for dy in range(3):                                    # static unroll
        slab = x_ref[pl.ds(row0 + dy, h_tile)]             # (h_tile, W, 3*Cin) bf16
        lhs = slab.reshape(rows, cin3)                      # contiguous collapse (W % 8 == 0)
        acc = acc + jnp.dot(lhs, w_ref[dy],
                            preferred_element_type=jnp.float32)

    # partial BN statistics from the f32 accumulator; reduced across tiles in the
    # wrapper so both grid axes stay "parallel" (no cross-iteration accumulator).
    psum = jnp.sum(acc, axis=0, keepdims=True)              # (1, Cout)
    psumsq = jnp.sum(acc * acc, axis=0, keepdims=True)
    stats_ref[...] = jnp.concatenate([psum, psumsq], axis=0)

    # bf16, unpadded store (halves intermediate HBM traffic vs f32; no 128-pad).
    conv_ref[...] = acc.astype(jnp.bfloat16)


def bn_relu_kernel(y_ref, scale_ref, shift_ref, o_ref):
    # all-f32 elementwise (v5e-safe); scale/shift are (1, W*Cout) lane vectors
    y = y_ref[...].astype(jnp.float32)
    o_ref[...] = jnp.maximum(y * scale_ref[...] + shift_ref[...], 0.0)


def _pick_h_tile(H, W, target_rows=2048):
    divs = [d for d in range(8, H + 1, 8) if H % d == 0]
    assert divs, "H must be a multiple of 8"  # TODO(synk): pad ragged H instead
    fits = [d for d in divs if d * W <= target_rows]
    return max(fits) if fits else min(divs)


def conv_block(x_nchw, weight_oihw, gamma, beta, eps=1e-5):
    """Pallas ConvBlock forward. x_nchw: (N, Cin, H, W) -> (N, Cout, H, W), f32."""
    N, Cin, H, W = x_nchw.shape
    Cout = weight_oihw.shape[0]
    cin3 = 3 * Cin

    h_tile = _pick_h_tile(H, W)
    n_ht = H // h_tile
    tile_rows = h_tile * W
    R = N * H * W

    # ---- layout glue: one cheap XLA pass over the (3*Cin)-wide input ----
    x_nhwc = jnp.transpose(x_nchw, (0, 2, 3, 1))
    xp = jnp.pad(x_nhwc, ((0, 0), (1, 1), (1, 1), (0, 0)))
    # pre-pack the 3 dx taps along the lane axis: (N, H+2, W, 3*Cin) bf16
    xpk = jnp.concatenate([xp[:, :, dx:dx + W, :] for dx in range(3)],
                          axis=-1).astype(jnp.bfloat16)

    # weights OIHW -> [dy, dx*Cin + ci, co], matching the xpk lane packing
    w_dy = jnp.transpose(weight_oihw, (2, 3, 1, 0)).reshape(3, cin3, Cout)
    w_dy = w_dy.astype(jnp.bfloat16)

    kern1 = functools.partial(conv_stats_kernel, h_tile=h_tile, w_out=W,
                              cin3=cin3, cout=Cout)
    conv_out, stats = pl.pallas_call(
        kern1,
        out_shape=(jax.ShapeDtypeStruct((R, Cout), jnp.bfloat16),
                   jax.ShapeDtypeStruct((N, n_ht, 2, Cout), jnp.float32)),
        grid_spec=pltpu.PrefetchScalarGridSpec(
            num_scalar_prefetch=0,
            grid=(N, n_ht),
            in_specs=[
                # whole padded image per n; block index is constant across t, so
                # the pipeline DMAs it once per batch element (no halo stack).
                pl.BlockSpec((None, H + 2, W, cin3), lambda n, t: (n, 0, 0, 0)),
                pl.BlockSpec((3, cin3, Cout), lambda n, t: (0, 0, 0)),
            ],
            out_specs=[
                pl.BlockSpec((tile_rows, Cout), lambda n, t: (n * n_ht + t, 0)),
                pl.BlockSpec((None, None, 2, Cout), lambda n, t: (n, t, 0, 0)),
            ]),
        compiler_params=pltpu.CompilerParams(
            dimension_semantics=("parallel", "parallel")),
    )(xpk, w_dy)

    # ---- tiny cross-tile BN reduction + fold gamma/beta into scale/shift ----
    count = jnp.float32(R)
    sums = jnp.sum(stats[:, :, 0, :], axis=(0, 1))                # (Cout,)
    sumsq = jnp.sum(stats[:, :, 1, :], axis=(0, 1))
    mean = sums / count
    var = jnp.maximum(sumsq / count - mean * mean, 0.0)           # biased (train-mode) var
    scale = gamma.astype(jnp.float32) * jax.lax.rsqrt(var + eps)
    shift = beta.astype(jnp.float32) - mean * scale

    # free reshape of the contiguous (R, Cout) buffer into lane-dense rows of
    # W*Cout (=128 here) lanes; scale/shift tiled to the same (w, c) packing.
    lanes = W * Cout
    rows2 = N * H
    conv_packed = conv_out.reshape(rows2, lanes)
    scale_p = jnp.tile(scale, W).reshape(1, lanes)
    shift_p = jnp.tile(shift, W).reshape(1, lanes)

    tile2 = rows2
    for cand in (2048, 1024, 512, 256, 128, 64, 32, 16, 8):
        if rows2 % cand == 0:
            tile2 = cand
            break

    # ---- pass 2: normalize + ReLU on unpadded, lane-dense rows ----
    out_flat = pl.pallas_call(
        bn_relu_kernel,
        out_shape=jax.ShapeDtypeStruct((rows2, lanes), jnp.float32),
        grid_spec=pltpu.PrefetchScalarGridSpec(
            num_scalar_prefetch=0,
            grid=(rows2 // tile2,),
            in_specs=[pl.BlockSpec((tile2, lanes), lambda i: (i, 0)),
                      pl.BlockSpec((1, lanes), lambda i: (0, 0)),
                      pl.BlockSpec((1, lanes), lambda i: (0, 0))],
            out_specs=pl.BlockSpec((tile2, lanes), lambda i: (i, 0))),
        compiler_params=pltpu.CompilerParams(
            dimension_semantics=("parallel",)),
    )(conv_packed, scale_p, shift_p)

    # unpadded data only: reshape + NCHW transpose (no channel slice needed)
    out = out_flat.reshape(N, H, W, Cout)
    return jnp.transpose(out, (0, 3, 1, 2))


def reference(x_nchw, weight_oihw, gamma, beta, eps=1e-5):
    """Pure-JAX f32 reference matching PyTorch ConvBlock.forward (train-mode BN)."""
    y = jax.lax.conv_general_dilated(
        x_nchw.astype(jnp.float32), weight_oihw.astype(jnp.float32),
        window_strides=(1, 1), padding="SAME",
        dimension_numbers=("NCHW", "OIHW", "NCHW"))
    mean = jnp.mean(y, axis=(0, 2, 3), keepdims=True)
    var = jnp.mean((y - mean) ** 2, axis=(0, 2, 3), keepdims=True)
    y = (y - mean) / jnp.sqrt(var + eps)
    y = y * gamma.reshape(1, -1, 1, 1) + beta.reshape(1, -1, 1, 1)
    return jnp.maximum(y, 0.0)


if __name__ == "__main__":
    key = jax.random.PRNGKey(0)
    k_x, k_w, k_g, k_b = jax.random.split(key, 4)

    N, Cin, Cout, H, W = 2, 4, 8, 16, 16

    x = jax.random.normal(k_x, (N, Cin, H, W), dtype=jnp.float32)
    # Conv2d(inplanes=4, planes=8, kernel_size=3, bias=False) -> (8, 4, 3, 3)
    weight = 0.1 * jax.random.normal(k_w, (Cout, Cin, 3, 3), dtype=jnp.float32)
    # BatchNorm2d(planes=8) affine params (deterministic, non-trivial)
    gamma = 1.0 + 0.1 * jax.random.normal(k_g, (Cout,), dtype=jnp.float32)
    beta = 0.1 * jax.random.normal(k_b, (Cout,), dtype=jnp.float32)

    out = jax.block_until_ready(conv_block(x, weight, gamma, beta))
    ref = jax.block_until_ready(reference(x, weight, gamma, beta))

    assert out.shape == (N, Cout, H, W)
    # bf16 MXU operands + bf16 intermediate (f32 accumulate/stats) -> relaxed tol
    assert jnp.allclose(out, ref, atol=3e-2, rtol=3e-2), \
        f"max abs err = {jnp.max(jnp.abs(out - ref))}"

    print("KERNEL_OK")
</pallas_src>

<mosaic_0001>
module attributes {stable_mosaic.version = 11 : i64} {
  func.func @conv_stats_kernel(%arg0: i32, %arg1: i32, %arg2: memref<1x18x16x12xbf16, #tpu.memory_space<vmem>>, %arg3: memref<3x12x8xbf16, #tpu.memory_space<vmem>>, %arg4: memref<256x8xbf16, #tpu.memory_space<vmem>>, %arg5: memref<1x1x2x8xf32, #tpu.memory_space<vmem>>) attributes {dimension_semantics = [#tpu.dimension_semantics<parallel>, #tpu.dimension_semantics<parallel>], iteration_bounds = array<i64: 2, 1>, scalar_prefetch = 0 : i64, scratch_operands = 0 : i64, tpu.core_type = #tpu.core_type<tc>, window_params = [{transform_indices = @transform_0, window_bounds = array<i64: 1, 18, 16, 12>}, {pipeline_mode = #tpu.pipeline_mode<synchronous>, transform_indices = @transform_1, window_bounds = array<i64: 3, 12, 8>}, {transform_indices = @transform_2, window_bounds = array<i64: 256, 8>}, {transform_indices = @transform_3, window_bounds = array<i64: 1, 1, 2, 8>}]} {
    %c16_i32 = arith.constant 16 : i32
    %0 = arith.muli %arg1, %c16_i32 : i32
    %cst = arith.constant 0.000000e+00 : f32
    %1 = vector.broadcast %cst : f32 to vector<256x8xf32>
    %c0_i32 = arith.constant 0 : i32
    %2 = arith.addi %0, %c0_i32 : i32
    %c0 = arith.constant 0 : index
    %3 = arith.index_cast %2 : i32 to index
    %c0_0 = arith.constant 0 : index
    %c0_1 = arith.constant 0 : index
    %4 = vector.load %arg2[%c0, %3, %c0_0, %c0_1] : memref<1x18x16x12xbf16, #tpu.memory_space<vmem>>, vector<1x16x16x12xbf16>
    %5 = vector.shape_cast %4 : vector<1x16x16x12xbf16> to vector<16x16x12xbf16>
    %6 = vector.shape_cast %5 : vector<16x16x12xbf16> to vector<256x12xbf16>
    %c0_2 = arith.constant 0 : index
    %c0_3 = arith.constant 0 : index
    %c0_4 = arith.constant 0 : index
    %7 = vector.load %arg3[%c0_2, %c0_3, %c0_4] : memref<3x12x8xbf16, #tpu.memory_space<vmem>>, vector<1x12x8xbf16>
    %8 = vector.shape_cast %7 : vector<1x12x8xbf16> to vector<12x8xbf16>
    %cst_5 = arith.constant dense<0.000000e+00> : vector<256x8xf32>
    %9 = tpu.matmul %6, %8, %cst_5 {dimension_numbers = #tpu.dot_dimension_numbers<[1], [0], [0], [1], [0, 0, 1, 1], [], []>} : vector<256x12xbf16>, vector<12x8xbf16>, vector<256x8xf32> -> vector<256x8xf32>
    %10 = arith.addf %1, %9 : vector<256x8xf32>
    %c1_i32 = arith.constant 1 : i32
    %11 = arith.addi %0, %c1_i32 : i32
    %c0_6 = arith.constant 0 : index
    %12 = arith.index_cast %11 : i32 to index
    %c0_7 = arith.constant 0 : index
    %c0_8 = arith.constant 0 : index
    %13 = vector.load %arg2[%c0_6, %12, %c0_7, %c0_8] : memref<1x18x16x12xbf16, #tpu.memory_space<vmem>>, vector<1x16x16x12xbf16>
    %14 = vector.shape_cast %13 : vector<1x16x16x12xbf16> to vector<16x16x12xbf16>
    %15 = vector.shape_cast %14 : vector<16x16x12xbf16> to vector<256x12xbf16>
    %c1 = arith.constant 1 : index
    %c0_9 = arith.constant 0 : index
    %c0_10 = arith.constant 0 : index
    %16 = vector.load %arg3[%c1, %c0_9, %c0_10] : memref<3x12x8xbf16, #tpu.memory_space<vmem>>, vector<1x12x8xbf16>
    %17 = vector.shape_cast %16 : vector<1x12x8xbf16> to vector<12x8xbf16>
    %cst_11 = arith.constant dense<0.000000e+00> : vector<256x8xf32>
    %18 = tpu.matmul %15, %17, %cst_11 {dimension_numbers = #tpu.dot_dimension_numbers<[1], [0], [0], [1], [0, 0, 1, 1], [], []>} : vector<256x12xbf16>, vector<12x8xbf16>, vector<256x8xf32> -> vector<256x8xf32>
    %19 = arith.addf %10, %18 : vector<256x8xf32>
    %c2_i32 = arith.constant 2 : i32
    %20 = arith.addi %0, %c2_i32 : i32
    %c0_12 = arith.constant 0 : index
    %21 = arith.index_cast %20 : i32 to index
    %c0_13 = arith.constant 0 : index
    %c0_14 = arith.constant 0 : index
    %22 = vector.load %arg2[%c0_12, %21, %c0_13, %c0_14] : memref<1x18x16x12xbf16, #tpu.memory_space<vmem>>, vector<1x16x16x12xbf16>
    %23 = vector.shape_cast %22 : vector<1x16x16x12xbf16> to vector<16x16x12xbf16>
    %24 = vector.shape_cast %23 : vector<16x16x12xbf16> to vector<256x12xbf16>
    %c2 = arith.constant 2 : index
    %c0_15 = arith.constant 0 : index
    %c0_16 = arith.constant 0 : index
    %25 = vector.load %arg3[%c2, %c0_15, %c0_16] : memref<3x12x8xbf16, #tpu.memory_space<vmem>>, vector<1x12x8xbf16>
    %26 = vector.shape_cast %25 : vector<1x12x8xbf16> to vector<12x8xbf16>
    %cst_17 = arith.constant dense<0.000000e+00> : vector<256x8xf32>
    %27 = tpu.matmul %24, %26, %cst_17 {dimension_numbers = #tpu.dot_dimension_numbers<[1], [0], [0], [1], [0, 0, 1, 1], [], []>} : vector<256x12xbf16>, vector<12x8xbf16>, vector<256x8xf32> -> vector<256x8xf32>
    %28 = arith.addf %19, %27 : vector<256x8xf32>
    %cst_18 = arith.constant dense<0.000000e+00> : vector<8xf32>
    %29 = vector.multi_reduction <add>, %28, %cst_18 [0] : vector<256x8xf32> to vector<8xf32>
    %30 = vector.shape_cast %29 : vector<8xf32> to vector<1x8xf32>
    %31 = arith.mulf %28, %28 : vector<256x8xf32>
    %cst_19 = arith.constant dense<0.000000e+00> : vector<8xf32>
    %32 = vector.multi_reduction <add>, %31, %cst_19 [0] : vector<256x8xf32> to vector<8xf32>
    %33 = vector.shape_cast %32 : vector<8xf32> to vector<1x8xf32>
    %34 = tpu.concatenate %30, %33 in 0 : vector<1x8xf32>, vector<1x8xf32> -> vector<2x8xf32>
    %c0_20 = arith.constant 0 : index
    %c0_21 = arith.constant 0 : index
    %c0_22 = arith.constant 0 : index
    %c0_23 = arith.constant 0 : index
    %35 = vector.load %arg5[%c0_20, %c0_21, %c0_22, %c0_23] : memref<1x1x2x8xf32, #tpu.memory_space<vmem>>, vector<1x1x2x8xf32>
    %36 = vector.shape_cast %35 : vector<1x1x2x8xf32> to vector<2x8xf32>
    %37 = vector.shape_cast %34 : vector<2x8xf32> to vector<1x1x2x8xf32>
    tpu.vector_store %arg5[%c0_20, %c0_21, %c0_22, %c0_23], %37 {strides = array<i32>} : memref<1x1x2x8xf32, #tpu.memory_space<vmem>>, vector<1x1x2x8xf32>,
    %38 = arith.truncf %28 : vector<256x8xf32> to vector<256x8xbf16>
    %c0_24 = arith.constant 0 : index
    %c0_25 = arith.constant 0 : index
    %39 = vector.load %arg4[%c0_24, %c0_25] : memref<256x8xbf16, #tpu.memory_space<vmem>>, vector<256x8xbf16>
    tpu.vector_store %arg4[%c0_24, %c0_25], %38 {strides = array<i32>} : memref<256x8xbf16, #tpu.memory_space<vmem>>, vector<256x8xbf16>,
    return
  }
  func.func @transform_0(%arg0: i32, %arg1: i32) -> (i32, i32, i32, i32) {
    %c0_i32 = arith.constant 0 : i32
    %c0_i32_0 = arith.constant 0 : i32
    %c0_i32_1 = arith.constant 0 : i32
    %c0_i32_2 = arith.constant 0 : i32
    return %arg0, %c0_i32, %c0_i32_0, %c0_i32_1 : i32, i32, i32, i32
  }
  func.func @transform_1(%arg0: i32, %arg1: i32) -> (i32, i32, i32) {
    %c0_i32 = arith.constant 0 : i32
    %c0_i32_0 = arith.constant 0 : i32
    %c0_i32_1 = arith.constant 0 : i32
    %c0_i32_2 = arith.constant 0 : i32
    return %c0_i32, %c0_i32_0, %c0_i32_1 : i32, i32, i32
  }
  func.func @transform_2(%arg0: i32, %arg1: i32) -> (i32, i32) {
    %c1_i32 = arith.constant 1 : i32
    %0 = arith.muli %arg0, %c1_i32 : i32
    %1 = arith.addi %0, %arg1 : i32
    %c0_i32 = arith.constant 0 : i32
    %c0_i32_0 = arith.constant 0 : i32
    return %1, %c0_i32 : i32, i32
  }
  func.func @transform_3(%arg0: i32, %arg1: i32) -> (i32, i32, i32, i32) {
    %c0_i32 = arith.constant 0 : i32
    %c0_i32_0 = arith.constant 0 : i32
    %c0_i32_1 = arith.constant 0 : i32
    return %arg0, %arg1, %c0_i32, %c0_i32_0 : i32, i32, i32, i32
  }
}

</mosaic_0001>

<bundles_post_ra>
// kernel: tpu_custom_call.1
= control target key start
LH: loop header
LB: loop body
LE: loop exit
PB: predicated region body
PF: predicated region fallthrough
CT: control target
= control target key end

     0   :  { %9 = vsyncpa [#allocation3], 0  ;;  %s2773_s0 = inlined_call_operand.vmem [shape: bf16[2,18,16,12], index: 0, kind: input, shape index: {}]   ;;  %s2774_s1 = inlined_call_operand.vmem [shape: bf16[3,12,8], index: 1, kind: input, shape index: {}]   ;;  %s2775_s2 = inlined_call_operand.vmem [shape: bf16[512,8], index: 2, kind: output, shape index: {0}]   ;;  %s2776_s3 = inlined_call_operand.hbm [shape: f32[2,1,2,8], index: 3, kind: output, shape index: {1}]  }
   0x1   :  { %11 = vsyncpa [#allocation3 + $0x1], 0  ;;  %s2385_s12 = smov 0   ;;  %s2387_s13 = smov 0  }
   0x2   :  { %s2389_s14 = smov 0   ;;  %s2391_s15 = smov 0  }
   0x3   :  { %s2393_s16 = smov 0   ;;  %s2395_s17 = smov 0  }
   0x4 LB: > { %s1710_s18 = sadd.s32 4294967295, %s2362_s17   ;;  %s1711_s19 = sadd.s32 4294967294, %s2362_s17   ;;  %s2362_s17 = sphi %s2395_s17, %s17_s17   ;;  %s2358_s16 = sphi %s2393_s16, %s2783_s16   ;;  %s2354_s15 = sphi %s2391_s15, %s2782_s15   ;;  %s2350_s14 = sphi %s2389_s14, %s2781_s14   ;;  %s2346_s13 = sphi %s2387_s13, %s2780_s13   ;;  %s2342_s12 = sphi %s2385_s12, %s2779_s12  }
   0x5   : > { %s29_s20 = sadd.s32 1, %s2358_s16  ;;  %s113_s21 = sadd.s32 1, %s2350_s14 }
   0x6   : > { %p31_p0 = scmp.ge.s32.totalorder %s29_s20, 2  ;;  %p123_p1 = scmp.ne.s32.totalorder %s2350_s14, %s2346_s13 }
   0x7   : > { %p124_p2 = scmp.eq.s32.totalorder %s1710_s18, 1  ;;  %p129_p3 = scmp.ne.s32.totalorder %s2346_s13, %s2342_s12 }
   0x8   : > { %s2785_s20 = smov (%p31_p0, %s29_s20), 0  ;;  %p130_p5 = scmp.eq.s32.totalorder %s1711_s19, 1 }
   0x9   : > { %p2425_p4 = por %p124_p2, %p123_p1  ;;  %s108_s23 = ssub.s32 %s2358_s16, %s2785_s20 }
   0xa   : > { %p1714_p6 = scmp.ge.s32.totalorder %s2362_s17, 1  ;;  %p111_p7 = scmp.eq.s32.totalorder %s108_s23, 0 }
   0xb   : > { %p2432_p8 = por %p130_p5, %p129_p3  ;;  %p159_p9 = scmp.lt.s32.totalorder %s2362_s17, 3 }
   0xc   : > { %s2438_s25 = scalar_select %p111_p7, %s2350_s14, %s113_s21  }
   0xd   : > { %p160_p10 = pnand %p1714_p6, %p159_p9 }
   0xe   : > { %v2233_v0 = vld [vmem:[%s2774_s1 + $0x8] sm:$0x3f] (!%p160_p10)   ;;  %vm414_vm0 = vcmask (!%p160_p10), 1045504   ;;  %p189_p11 = scmp.lt.s32.totalorder (!%p160_p10), %s2354_s15, 1  ;;  %v2234_v1 = vld [vmem:[%s2774_s1] sm:$0x3f] (!%p160_p10)  }
   0xf   : > { %163 = sbr.rel (%p160_p10) target bundleno = 370 (0x172), region = 28  ;;  %2173 = vmatprep.subr.msk.bf16.mxu1 (!%p160_p10), %vm414_vm0, %v2233_v0  ;;  %v416_v2 = vsel (!%p160_p10), %vm414_vm0, %v2233_v0, 0  ;;  %v2237_v3 = vld [vmem:[%s2774_s1 + $0x10] sm:$0x3f] (!%p160_p10)   ;;  %2174 = vmatprep.subr.msk.bf16.mxu0 (!%p160_p10), %vm414_vm0, %v2234_v1  ;;  %v713_v4 = vsel (!%p160_p10), %vm414_vm0, %v2234_v1, 0  ;;  %vm365_vm1 = vcmask (!%p160_p10), 97280  }
  0x10   : > { %2006 = vmatpush3.bf16.msra.mxu1 (!%p160_p10), %v416_v2  ;;  %2040 = vmatpush3.bf16.msra.mxu0 (!%p160_p10), %v713_v4  ;;  %v1049_v9 = vsel (!%p160_p10), %vm414_vm0, %v2237_v3, 0  ;;  %s2568_s10 = sshll.u32 (!%p160_p10), %s2354_s15, 5  ;;  %vm1547_vm2 = vcmask (!%p160_p10), 60416   ;;  %vm1244_vm3 = vcmask (!%p160_p10), 64512   ;;  %s186_s23 = sand.u32 (!%p160_p10), 1, %s2346_s13   ;;  %vm1415_vm4 = vcmask (!%p160_p10), 1040384  }
  0x11   : > { %2175 = vmatprep.subr.msk.bf16.mxu1 (!%p160_p10), %vm414_vm0, %v2234_v1  ;;  %2176 = vmatprep.subr.msk.bf16.mxu0 (!%p160_p10), %vm414_vm0, %v2237_v3  ;;  %p196_p12 = scmp.lt.s32.totalorder (!%p160_p10), %s2568_s10, 63  ;;  %s1715_s26 = sshll.u32 (!%p160_p10), %s186_s23, 1  ;;  %vm1417_vm5 = vcmask (!%p160_p10), 58368  }
  0x12   : > { %s188_s27 = scalar_lea.vmem (!%p160_p10), [#allocation2], %s1715_s26  ;;  %s2726_s4 = scalar_lea.hbm (!%p160_p10), %s2776_s3, %s2568_s10 }
  0x13   : > { %s1606_s28 = sshll.u32 (!%p160_p10), %s188_s27, 4  ;;  %s1587_s5 = scalar_lea.sflag (!%p160_p10), [#allocation3], %s186_s23  ;;  %s2728_s28 = int_to_ptr.vmem [resolvable:$true] %s1606_s28 }
  0x14   : > { %s2364_s7 = smov (!%p160_p10), [#allocation2]  }
  0x15   : > { %s2288_s8 = sshll.u32 (!%p160_p10), %s2364_s7, 4  ;;  %s2289_s8 = int_to_ptr.vmem [resolvable:$false] %s2288_s8 }
  0x16   : > { %s190_s30 = scalar_select %p189_p11, %s2354_s15, 1 }
  0x17   : > { %s197_s11 = scalar_select %p196_p12, %s2568_s10, 63 }
  0x18   : > { %s2177_s6 = smul.u32 144, %s190_s30  ;;  %p2291_p2 = scmp.lt.s32.totalorder %s2728_s28, %s2289_s8 }
  0x19   : > { %s1718_s18 = sshll.u32 %s197_s11, 2 }
  0x1a   : > { %s2460_s9 = scalar_lea.vmem %s2773_s0, %s2177_s6  ;;  %s2583_s21 = scalar_lea.vmem %s2775_s2, %s1718_s18 }
  0x1b   : > { %v2235_v5 = vld [vmem:[%s2460_s9 + $0x8] sm:$0xff]   ;;  %v2236_v6 = vld [vmem:[%s2460_s9] sm:$0xff]   ;;  %v2238_v7 = vld [vmem:[%s2460_s9 + $0x10] sm:$0xff]   ;;  %s2284_s6 = scalar_lea.vmem %s2728_s28, 32 }
  0x1c   : > { %2007 = vmatprep.mubr.msk.bf16.mxu1 %vm365_vm1, %v2235_v5  ;;  %2041 = vmatprep.mubr.msk.bf16.mxu0 %vm365_vm1, %v2236_v6  ;;  %v2239_v8 = vld [vmem:[%s2460_s9 + $0x8] sm:$0xff]   ;;  %v2240_v10 = vld [vmem:[%s2460_s9 + $0x18] sm:$0xff]   ;;  %v2241_v11 = vld [vmem:[%s2460_s9 + $0x10] sm:$0xff]   ;;  %p2285_p13 = scmp.ne.s32.totalorder %s2728_s28, %s2284_s6 }
  0x1d   : > { %2008 = vmatmul.mubr.msk.bf16.vlgmr.msra.gmra.mrb[0].mxu1 %vm365_vm1, %v2238_v7  ;;  %2042 = vmatmul.mubr.msk.bf16.vlgmr.msra.gmra.mrb[0].mxu0 %vm365_vm1, %v2239_v8  ;;  %v2242_v12 = vld [vmem:[%s2460_s9 + $0x20] sm:$0xff]   ;;  %v2243_v13 = vld [vmem:[%s2460_s9 + $0x18] sm:$0xff]   ;;  %v2244_v14 = vld [vmem:[%s2460_s9 + $0x28] sm:$0xff]  }
  0x1e   : > { %2108 = vmatpush3.bf16.msra.mxu1 %v713_v4  ;;  %2074 = vmatpush3.bf16.msra.mxu0 %v1049_v9  ;;  %v2245_v15 = vld [vmem:[%s2460_s9 + $0x20] sm:$0xff]   ;;  %v2246_v16 = vld [vmem:[%s2460_s9 + $0x30] sm:$0xff]   ;;  %v2247_v17 = vld [vmem:[%s2460_s9 + $0x28] sm:$0xff]   ;;  %p2286_p0 = pnand %p2285_p13, %p2425_p4 }
  0x1f   : > { %2011 = vmatprep.mubr.msk.bf16.mxu1 %vm365_vm1, %v2240_v10  ;;  %2045 = vmatprep.mubr.msk.bf16.mxu0 %vm365_vm1, %v2241_v11  ;;  %v2248_v18 = vld [vmem:[%s2460_s9 + $0x38] sm:$0xff]   ;;  %v2249_v19 = vld [vmem:[%s2460_s9 + $0x30] sm:$0xff]   ;;  %v2250_v20 = vld [vmem:[%s2460_s9 + $0x40] sm:$0xff]  }
  0x20   : > { %v2251_v21 = vld [vmem:[%s2460_s9 + $0x38] sm:$0xff]   ;;  %v2252_v22 = vld [vmem:[%s2460_s9 + $0x48] sm:$0xff]   ;;  %v2253_v23 = vld [vmem:[%s2460_s9 + $0x10] sm:$0xff]   ;;  %p2287_p1 = pneg %p2286_p0 }
  0x21   : > { %v2254_v24 = vld [vmem:[%s2460_s9 + $0x50] sm:$0xff]   ;;  %v2255_v25 = vld [vmem:[%s2460_s9 + $0x18] sm:$0xff]   ;;  %v2257_v27 = vld [vmem:[%s2460_s9 + $0x20] sm:$0xff]  }
  0x22   : > { %v2256_v26 = vld [vmem:[%s2460_s9 + $0x58] sm:$0xff]   ;;  %v2258_v28 = vld [vmem:[%s2460_s9 + $0x60] sm:$0xff]   ;;  %v2259_v29 = vld [vmem:[%s2460_s9 + $0x28] sm:$0xff]  }
  0x23   : > { %v2260_v30 = vld [vmem:[%s2460_s9 + $0x68] sm:$0xff]   ;;  %v2261_v31 = vld [vmem:[%s2460_s9 + $0x30] sm:$0xff]   ;;  %v2263_v33 = vld [vmem:[%s2460_s9 + $0x38] sm:$0xff]  }
  0x24   : > { %v2262_v32 = vld [vmem:[%s2460_s9 + $0x70] sm:$0xff]   ;;  %v2264_v34 = vld [vmem:[%s2460_s9 + $0x78] sm:$0xff]   ;;  %v2265_v35 = vld [vmem:[%s2460_s9 + $0x40] sm:$0xff]  }
  0x25   : > { %2012 = vmatmul.mubr.msk.bf16.gmra.mrb[4].mxu1 %vm365_vm1, %v2242_v12  ;;  %2046 = vmatmul.mubr.msk.bf16.gmra.mrb[4].mxu0 %vm365_vm1, %v2243_v13  ;;  %v2266_v36 = vld [vmem:[%s2460_s9 + $0x80] sm:$0xff]   ;;  %v2267_v37 = vld [vmem:[%s2460_s9 + $0x48] sm:$0xff]   ;;  %v2269_v39 = vld [vmem:[%s2460_s9 + $0x50] sm:$0xff]  }
  0x26   : > { %2015 = vmatprep.mubr.msk.bf16.mxu1 %vm365_vm1, %v2244_v14  ;;  %2049 = vmatprep.mubr.msk.bf16.mxu0 %vm365_vm1, %v2245_v15  ;;  %v2268_v38 = vld [vmem:[%s2460_s9 + $0x40] sm:$0xff]   ;;  %v2270_v40 = vld [vmem:[%s2460_s9 + $0x48] sm:$0xff]   ;;  %v2271_v41 = vld [vmem:[%s2460_s9 + $0x58] sm:$0xff]  }
  0x27   : > { %v2272_v42 = vld [vmem:[%s2460_s9 + $0x50] sm:$0xff]   ;;  %v2273_v43 = vld [vmem:[%s2460_s9 + $0x60] sm:$0xff]   ;;  %v2274_v44 = vld [vmem:[%s2460_s9 + $0x58] sm:$0xff]  }
  0x28   : > { %v2275_v45 = vld [vmem:[%s2460_s9 + $0x68] sm:$0xff]   ;;  %v2276_v46 = vld [vmem:[%s2460_s9 + $0x60] sm:$0xff]   ;;  %v2277_v47 = vld [vmem:[%s2460_s9 + $0x70] sm:$0xff]  }
  0x29   : > { %v2278_v48 = vld [vmem:[%s2460_s9 + $0x68] sm:$0xff]   ;;  %v2279_v49 = vld [vmem:[%s2460_s9 + $0x78] sm:$0xff]   ;;  %v2280_v50 = vld [vmem:[%s2460_s9 + $0x70] sm:$0xff]  }
  0x2a   : > { %v2281_v51 = vld [vmem:[%s2460_s9 + $0x80] sm:$0xff]   ;;  %v2282_v52 = vld [vmem:[%s2460_s9 + $0x78] sm:$0xff]   ;;  %v2283_v53 = vld [vmem:[%s2460_s9 + $0x88] sm:$0xff]   ;;  %s2290_s9 = scalar_lea.vmem %s2289_s8, 64 }
  0x2b   : > { %p2292_p3 = scmp.lt.s32.totalorder %s2290_s9, %s2284_s6 }
  0x2d   : > { %2016 = vmatmul.mubr.msk.bf16.gmra.mrb[8].mxu1 %vm365_vm1, %v2246_v16  ;;  %2050 = vmatmul.mubr.msk.bf16.gmra.mrb[8].mxu0 %vm365_vm1, %v2247_v17  ;;  %p2293_p5 = por %p2292_p3, %p2291_p2 }
  0x2e   : > { %2019 = vmatprep.mubr.msk.bf16.mxu1 %vm365_vm1, %v2248_v18  ;;  %2053 = vmatprep.mubr.msk.bf16.mxu0 %vm365_vm1, %v2249_v19 }
  0x2f   : > { %p2294_p6 = pnand %p2293_p5, %p2287_p1 }
  0x35   : > { %2020 = vmatmul.mubr.msk.bf16.gmra.mrb[12].mxu1 %vm365_vm1, %v2250_v20  ;;  %2054 = vmatmul.mubr.msk.bf16.gmra.mrb[12].mxu0 %vm365_vm1, %v2251_v21 }
  0x36   : > { %2023 = vmatprep.mubr.msk.bf16.mxu1 %vm365_vm1, %v2252_v22  ;;  %2075 = vmatprep.mubr.msk.bf16.mxu0 %vm365_vm1, %v2253_v23 }
  0x3d   : > { %2024 = vmatmul.mubr.msk.bf16.gmra.mrb[16].mxu1 %vm365_vm1, %v2254_v24  ;;  %2076 = vmatmul.mubr.msk.bf16.vlgmr.msra.gmra.mrb[0].mxu0 %vm365_vm1, %v2255_v25 }
  0x3e   : > { %2027 = vmatprep.mubr.msk.bf16.mxu1 %vm365_vm1, %v2256_v26  ;;  %2079 = vmatprep.mubr.msk.bf16.mxu0 %vm365_vm1, %v2257_v27 }
  0x45   : > { %2028 = vmatmul.mubr.msk.bf16.gmra.mrb[20].mxu1 %vm365_vm1, %v2258_v28  ;;  %2080 = vmatmul.mubr.msk.bf16.gmra.mrb[4].mxu0 %vm365_vm1, %v2259_v29 }
  0x46   : > { %2031 = vmatprep.mubr.msk.bf16.mxu1 %vm365_vm1, %v2260_v30  ;;  %2083 = vmatprep.mubr.msk.bf16.mxu0 %vm365_vm1, %v2261_v31 }
  0x4d   : > { %2032 = vmatmul.mubr.msk.bf16.gmra.mrb[24].mxu1 %vm365_vm1, %v2262_v32  ;;  %2084 = vmatmul.mubr.msk.bf16.gmra.mrb[8].mxu0 %vm365_vm1, %v2263_v33 }
  0x4e   : > { %2035 = vmatprep.mubr.msk.bf16.mxu1 %vm365_vm1, %v2264_v34  ;;  %2087 = vmatprep.mubr.msk.bf16.mxu0 %vm365_vm1, %v2265_v35 }
  0x55   : > { %2036 = vmatmul.mubr.msk.bf16.gmra.mrb[28].mxu1 %vm365_vm1, %v2266_v36  ;;  %2088 = vmatmul.mubr.msk.bf16.gmra.mrb[12].mxu0 %vm365_vm1, %v2267_v37 }
  0x56   : > { %2057 = vmatprep.mubr.msk.bf16.mxu1 %vm365_vm1, %v2268_v38  ;;  %2091 = vmatprep.mubr.msk.bf16.mxu0 %vm365_vm1, %v2269_v39 }
  0x5d   : > { %2058 = vmatmul.mubr.msk.bf16.vlgmr.msra.gmra.mrb[16].mxu1 %vm365_vm1, %v2270_v40  ;;  %2092 = vmatmul.mubr.msk.bf16.gmra.mrb[16].mxu0 %vm365_vm1, %v2271_v41 }
  0x5e   : > { %2061 = vmatprep.mubr.msk.bf16.mxu1 %vm365_vm1, %v2272_v42  ;;  %2095 = vmatprep.mubr.msk.bf16.mxu0 %vm365_vm1, %v2273_v43 }
  0x65   : > { %2062 = vmatmul.mubr.msk.bf16.gmra.mrb[20].mxu1 %vm365_vm1, %v2274_v44  ;;  %2096 = vmatmul.mubr.msk.bf16.gmra.mrb[20].mxu0 %vm365_vm1, %v2275_v45 }
  0x66   : > { %2065 = vmatprep.mubr.msk.bf16.mxu1 %vm365_vm1, %v2276_v46  ;;  %2099 = vmatprep.mubr.msk.bf16.mxu0 %vm365_vm1, %v2277_v47 }
  0x6d   : > { %2066 = vmatmul.mubr.msk.bf16.gmra.mrb[24].mxu1 %vm365_vm1, %v2278_v48  ;;  %2100 = vmatmul.mubr.msk.bf16.gmra.mrb[24].mxu0 %vm365_vm1, %v2279_v49 }
  0x6e   : > { %2069 = vmatprep.mubr.msk.bf16.mxu1 %vm365_vm1, %v2280_v50  ;;  %2103 = vmatprep.mubr.msk.bf16.mxu0 %vm365_vm1, %v2281_v51 }
  0x75   : > { %2070 = vmatmul.mubr.msk.bf16.gmra.mrb[28].mxu1 %vm365_vm1, %v2282_v52  ;;  %2104 = vmatmul.mubr.msk.bf16.gmra.mrb[28].mxu0 %vm365_vm1, %v2283_v53 }
  0xf0   : > { %v2009_v54 = vpop.f32.mrb[0].mxu1 }
  0xf1   : > { %v452_v55 = vpop.f32.mrb[1].mxu1 }
  0xf2   : > { %v2010_v56 = vpop.f32.mrb[2].mxu1 }
  0xf3   : > { %v455_v57 = vpop.f32.mrb[3].mxu1 }
  0xf8   : > { %v2013_v58 = vpop.f32.mrb[4].mxu1 }
  0xf9   : > { %v468_v59 = vpop.f32.mrb[5].mxu1 }
  0xfa   : > { %v2014_v60 = vpop.f32.mrb[6].mxu1 }
  0xfb   : > { %v471_v61 = vpop.f32.mrb[7].mxu1 }
 0x100   : > { %v2559_v62 = vpop.f32.mrb[8].mxu1 }
 0x101   : > { %v2561_v63 = vpop.f32.mrb[9].mxu1 }
 0x102   : > { %v2563_v0 = vpop.f32.mrb[10].mxu1 }
 0x103   : > { %v2565_v1 = vpop.f32.mrb[11].mxu1 }
 0x108   : > { %v2570_v2 = vpop.f32.mrb[12].mxu1 }
 0x109   : > { %v2573_v3 = vpop.f32.mrb[13].mxu1 }
 0x10a   : > { %v2575_v4 = vpop.f32.mrb[14].mxu1 }
 0x10b   : > { %v2577_v5 = vpop.f32.mrb[15].mxu1 }
 0x110   : > { %v2077_v6 = vpop.f32.mrb[0].mxu0 }
 0x111   : > { %v2109_v7 = vadd.f32 %v2077_v6, %v2009_v54  ;;  %v1085_v8 = vpop.f32.mrb[1].mxu0 }
 0x112   : > { %v2110_v9 = vadd.f32 %v1085_v8, %v452_v55  ;;  %v2078_v10 = vpop.f32.mrb[2].mxu0 }
 0x113   : > { %v1924_v11 = vpack.c.bf16 %v2109_v7, %v2109_v7  ;;  %v2111_v12 = vadd.f32 %v2078_v10, %v2010_v56  ;;  %v1088_v13 = vpop.f32.mrb[3].mxu0  ;;  %v1316_v17 = vmul.f32 %v2109_v7, %v2109_v7  ;;  %v1248_v25 = vsel %vm1244_vm3, %v2109_v7, 0.0 }
 0x114   : > { %v1314_v14 = vmul.f32 %v2110_v9, %v2110_v9  ;;  %v1922_v15 = vpack.c.bf16 %v2110_v9, %v2110_v9  ;;  %v2112_v16 = vadd.f32 %v1088_v13, %v455_v57  ;;  %v1245_v19 = vsel %vm1244_vm3, %v2110_v9, 0.0 }
 0x115   : > { %v1925_v18 = vpack.c.bf16 %v2111_v12, %v2111_v12  ;;  %1550 = vst.msk [vmem:[%s2583_s21 + $0x8] sm:$0xf] %vm1547_vm2, %v1924_v11  ;;  %v1317_v23 = vmul.f32 %v2111_v12, %v2111_v12  ;;  %v1349_v33 = vsel %vm1244_vm3, %v1316_v17, 0.0  ;;  %v1250_v36 = vsel %vm1244_vm3, %v2111_v12, 0.0 }
 0x116   : > { %v1246_v20 = vsel %vm1244_vm3, %v2112_v16, 0.0  ;;  %v1315_v21 = vmul.f32 %v2112_v16, %v2112_v16  ;;  %v1923_v22 = vpack.c.bf16 %v2112_v16, %v2112_v16  ;;  %1548 = vst.msk [vmem:[%s2583_s21] sm:$0xf] %vm1547_vm2, %v1922_v15  ;;  %v1346_v26 = vsel %vm1244_vm3, %v1314_v14, 0.0 }
 0x117   : > { %v1247_v24 = vadd.f32 %v1246_v20, %v1245_v19  ;;  %1551 = vst.msk [vmem:[%s2583_s21 + $0xc] sm:$0xf] %vm1547_vm2, %v1925_v18  ;;  %v1351_v37 = vsel %vm1244_vm3, %v1317_v23, 0.0 }
 0x118   : > { %v1347_v27 = vsel %vm1244_vm3, %v1315_v21, 0.0  ;;  %v2081_v28 = vpop.f32.mrb[4].mxu0  ;;  %1549 = vst.msk [vmem:[%s2583_s21 + $0x4] sm:$0xf] %vm1547_vm2, %v1923_v22 }
 0x119   : > { %v1249_v29 = vadd.f32 %v1248_v25, %v1247_v24  ;;  %v1348_v30 = vadd.f32 %v1347_v27, %v1346_v26  ;;  %v2113_v31 = vadd.f32 %v2081_v28, %v2013_v58  ;;  %v1101_v32 = vpop.f32.mrb[5].mxu0 }
 0x11a   : > { %v2114_v34 = vadd.f32 %v1101_v32, %v468_v59  ;;  %v2082_v35 = vpop.f32.mrb[6].mxu0 }
 0x11b   : > { %v1350_v38 = vadd.f32 %v1349_v33, %v1348_v30  ;;  %v1928_v39 = vpack.c.bf16 %v2113_v31, %v2113_v31  ;;  %v1104_v40 = vpop.f32.mrb[7].mxu0  ;;  %v1251_v41 = vadd.f32 %v1250_v36, %v1249_v29  ;;  %v2115_v46 = vadd.f32 %v2082_v35, %v2014_v60 }
 0x11c   : > { %v1252_v42 = vsel %vm1244_vm3, %v2114_v34, 0.0  ;;  %v1318_v43 = vmul.f32 %v2114_v34, %v2114_v34  ;;  %v1926_v44 = vpack.c.bf16 %v2114_v34, %v2114_v34  ;;  %v2116_v47 = vadd.f32 %v1104_v40, %v471_v61 }
 0x11d   : > { %v1352_v45 = vadd.f32 %v1351_v37, %v1350_v38  ;;  %1554 = vst.msk [vmem:[%s2583_s21 + $0x18] sm:$0xf] %vm1547_vm2, %v1928_v39  ;;  %v1253_v48 = vadd.f32 %v1252_v42, %v1251_v41  ;;  %v1320_v50 = vmul.f32 %v2113_v31, %v2113_v31  ;;  %v1929_v52 = vpack.c.bf16 %v2115_v46, %v2115_v46 }
 0x11e   : > { %v1353_v49 = vsel %vm1244_vm3, %v1318_v43, 0.0  ;;  %1552 = vst.msk [vmem:[%s2583_s21 + $0x10] sm:$0xf] %vm1547_vm2, %v1926_v44  ;;  %v1254_v53 = vsel %vm1244_vm3, %v2116_v47, 0.0  ;;  %v1319_v54 = vmul.f32 %v2116_v47, %v2116_v47  ;;  %v1927_v55 = vpack.c.bf16 %v2116_v47, %v2116_v47 }
 0x11f   : > { %v1354_v51 = vadd.f32 %v1353_v49, %v1352_v45  ;;  %v1255_v57 = vadd.f32 %v1254_v53, %v1253_v48  ;;  %1555 = vst.msk [vmem:[%s2583_s21 + $0x1c] sm:$0xf] %vm1547_vm2, %v1929_v52  ;;  %v1256_v60 = vsel %vm1244_vm3, %v2113_v31, 0.0  ;;  %v1321_v61 = vmul.f32 %v2115_v46, %v2115_v46 }
 0x120   : > { %v2085_v56 = vpop.f32.mrb[8].mxu0  ;;  %v1355_v6 = vsel %vm1244_vm3, %v1319_v54, 0.0  ;;  %1553 = vst.msk [vmem:[%s2583_s21 + $0x14] sm:$0xf] %vm1547_vm2, %v1927_v55  ;;  %v1357_v9 = vsel %vm1244_vm3, %v1320_v50, 0.0  ;;  %v1258_v10 = vsel %vm1244_vm3, %v2115_v46, 0.0 }
 0x121   : > { %v2117_v58 = vadd.f32 %v2085_v56, %v2559_v62  ;;  %v1117_v59 = vpop.f32.mrb[9].mxu0  ;;  %v1257_v62 = vadd.f32 %v1256_v60, %v1255_v57  ;;  %v1356_v11 = vadd.f32 %v1355_v6, %v1354_v51  ;;  %v1359_v19 = vsel %vm1244_vm3, %v1321_v61, 0.0 }
 0x122   : > { %v2118_v7 = vadd.f32 %v1117_v59, %v2561_v63  ;;  %v2086_v8 = vpop.f32.mrb[10].mxu0 }
 0x123   : > { %v1120_v12 = vpop.f32.mrb[11].mxu0  ;;  %v1932_v13 = vpack.c.bf16 %v2117_v58, %v2117_v58  ;;  %v1358_v17 = vadd.f32 %v1357_v9, %v1356_v11  ;;  %v1259_v18 = vadd.f32 %v1258_v10, %v1257_v62  ;;  %v2119_v63 = vadd.f32 %v2086_v8, %v2563_v0 }
 0x124   : > { %v1260_v14 = vsel %vm1244_vm3, %v2118_v7, 0.0  ;;  %v1322_v15 = vmul.f32 %v2118_v7, %v2118_v7  ;;  %v1930_v16 = vpack.c.bf16 %v2118_v7, %v2118_v7  ;;  %v2120_v21 = vadd.f32 %v1120_v12, %v2565_v1 }
 0x125   : > { %1558 = vst.msk [vmem:[%s2583_s21 + $0x28] sm:$0xf] %vm1547_vm2, %v1932_v13  ;;  %v1324_v22 = vmul.f32 %v2117_v58, %v2117_v58  ;;  %v1261_v23 = vadd.f32 %v1260_v14, %v1259_v18  ;;  %v1360_v24 = vadd.f32 %v1359_v19, %v1358_v17  ;;  %v1933_v25 = vpack.c.bf16 %v2119_v63, %v2119_v63 }
 0x126   : > { %v1361_v20 = vsel %vm1244_vm3, %v1322_v15, 0.0  ;;  %1556 = vst.msk [vmem:[%s2583_s21 + $0x20] sm:$0xf] %vm1547_vm2, %v1930_v16  ;;  %v1262_v26 = vsel %vm1244_vm3, %v2120_v21, 0.0  ;;  %v1323_v27 = vmul.f32 %v2120_v21, %v2120_v21  ;;  %v1931_v0 = vpack.c.bf16 %v2120_v21, %v2120_v21 }
 0x127   : > { %v1362_v29 = vadd.f32 %v1361_v20, %v1360_v24  ;;  %v1263_v30 = vadd.f32 %v1262_v26, %v1261_v23  ;;  %v1264_v32 = vsel %vm1244_vm3, %v2117_v58, 0.0  ;;  %v1325_v33 = vmul.f32 %v2119_v63, %v2119_v63  ;;  %1559 = vst.msk [vmem:[%s2583_s21 + $0x2c] sm:$0xf] %vm1547_vm2, %v1933_v25 }
 0x128   : > { %v2089_v28 = vpop.f32.mrb[12].mxu0  ;;  %v1363_v34 = vsel %vm1244_vm3, %v1323_v27, 0.0  ;;  %1557 = vst.msk [vmem:[%s2583_s21 + $0x24] sm:$0xf] %vm1547_vm2, %v1931_v0  ;;  %v1365_v37 = vsel %vm1244_vm3, %v1324_v22, 0.0  ;;  %v1266_v38 = vsel %vm1244_vm3, %v2119_v63, 0.0 }
 0x129   : > { %v2121_v31 = vadd.f32 %v2089_v28, %v2570_v2  ;;  %v1133_v1 = vpop.f32.mrb[13].mxu0  ;;  %v1265_v2 = vadd.f32 %v1264_v32, %v1263_v30  ;;  %v1364_v39 = vadd.f32 %v1363_v34, %v1362_v29  ;;  %v1367_v47 = vsel %vm1244_vm3, %v1325_v33, 0.0 }
 0x12a   : > { %v2122_v35 = vadd.f32 %v1133_v1, %v2573_v3  ;;  %v2090_v36 = vpop.f32.mrb[14].mxu0 }
 0x12b   : > { %v1136_v40 = vpop.f32.mrb[15].mxu0  ;;  %v1936_v41 = vpack.c.bf16 %v2121_v31, %v2121_v31  ;;  %v1366_v3 = vadd.f32 %v1365_v37, %v1364_v39  ;;  %v1267_v45 = vadd.f32 %v1266_v38, %v1265_v2  ;;  %v2123_v46 = vadd.f32 %v2090_v36, %v2575_v4 }
 0x12c   : > { %v1268_v42 = vsel %vm1244_vm3, %v2122_v35, 0.0  ;;  %v1326_v43 = vmul.f32 %v2122_v35, %v2122_v35  ;;  %v1934_v44 = vpack.c.bf16 %v2122_v35, %v2122_v35  ;;  %v2124_v49 = vadd.f32 %v1136_v40, %v2577_v5 }
 0x12d   : > { %1562 = vst.msk [vmem:[%s2583_s21 + $0x38] sm:$0xf] %vm1547_vm2, %v1936_v41  ;;  %v1328_v50 = vmul.f32 %v2121_v31, %v2121_v31  ;;  %v1269_v51 = vadd.f32 %v1268_v42, %v1267_v45  ;;  %v1368_v52 = vadd.f32 %v1367_v47, %v1366_v3  ;;  %v1937_v54 = vpack.c.bf16 %v2123_v46, %v2123_v46 }
 0x12e   : > { %v1369_v48 = vsel %vm1244_vm3, %v1326_v43, 0.0  ;;  %1560 = vst.msk [vmem:[%s2583_s21 + $0x30] sm:$0xf] %vm1547_vm2, %v1934_v44  ;;  %v1270_v55 = vsel %vm1244_vm3, %v2124_v49, 0.0  ;;  %v1327_v56 = vmul.f32 %v2124_v49, %v2124_v49  ;;  %v1935_v4 = vpack.c.bf16 %v2124_v49, %v2124_v49 }
 0x12f   : > { %v1370_v59 = vadd.f32 %v1369_v48, %v1368_v52  ;;  %v1271_v60 = vadd.f32 %v1270_v55, %v1269_v51  ;;  %v1272_v7 = vsel %vm1244_vm3, %v2121_v31, 0.0  ;;  %v1329_v8 = vmul.f32 %v2123_v46, %v2123_v46  ;;  %1563 = vst.msk [vmem:[%s2583_s21 + $0x3c] sm:$0xf] %vm1547_vm2, %v1937_v54 }
 0x130   : > { %v2059_v53 = vpop.f32.mrb[16].mxu1  ;;  %v2093_v57 = vpop.f32.mrb[16].mxu0  ;;  %v1371_v9 = vsel %vm1244_vm3, %v1327_v56, 0.0  ;;  %1561 = vst.msk [vmem:[%s2583_s21 + $0x34] sm:$0xf] %vm1547_vm2, %v1935_v4  ;;  %v1373_v12 = vsel %vm1244_vm3, %v1328_v50, 0.0 }
 0x131   : > { %v813_v58 = vpop.f32.mrb[17].mxu1  ;;  %v2125_v5 = vadd.f32 %v2093_v57, %v2059_v53  ;;  %v1149_v61 = vpop.f32.mrb[17].mxu0  ;;  %v1274_v13 = vsel %vm1244_vm3, %v2123_v46, 0.0  ;;  %v1273_v14 = vadd.f32 %v1272_v7, %v1271_v60  ;;  %v1372_v15 = vadd.f32 %v1371_v9, %v1370_v59 }
 0x132   : > { %v2060_v6 = vpop.f32.mrb[18].mxu1  ;;  %v2126_v10 = vadd.f32 %v1149_v61, %v813_v58  ;;  %v2094_v62 = vpop.f32.mrb[18].mxu0  ;;  %v1375_v23 = vsel %vm1244_vm3, %v1329_v8, 0.0 }
 0x133   : > { %v816_v11 = vpop.f32.mrb[19].mxu1  ;;  %v1152_v16 = vpop.f32.mrb[19].mxu0  ;;  %v1940_v17 = vpack.c.bf16 %v2125_v5, %v2125_v5  ;;  %v1374_v20 = vadd.f32 %v1373_v12, %v1372_v15  ;;  %v1275_v21 = vadd.f32 %v1274_v13, %v1273_v14  ;;  %v2127_v22 = vadd.f32 %v2094_v62, %v2060_v6 }
 0x134   : > { %v1276_v18 = vsel %vm1244_vm3, %v2126_v10, 0.0  ;;  %v1330_v63 = vmul.f32 %v2126_v10, %v2126_v10  ;;  %v1938_v19 = vpack.c.bf16 %v2126_v10, %v2126_v10  ;;  %v2128_v25 = vadd.f32 %v1152_v16, %v816_v11 }
 0x135   : > { %1566 = vst.msk [vmem:[%s2583_s21 + $0x48] sm:$0xf] %vm1547_vm2, %v1940_v17  ;;  %v1332_v26 = vmul.f32 %v2125_v5, %v2125_v5  ;;  %v1277_v27 = vadd.f32 %v1276_v18, %v1275_v21  ;;  %v1376_v0 = vadd.f32 %v1375_v23, %v1374_v20  ;;  %v1941_v29 = vpack.c.bf16 %v2127_v22, %v2127_v22 }
 0x136   : > { %v1377_v24 = vsel %vm1244_vm3, %v1330_v63, 0.0  ;;  %1564 = vst.msk [vmem:[%s2583_s21 + $0x40] sm:$0xf] %vm1547_vm2, %v1938_v19  ;;  %v1278_v30 = vsel %vm1244_vm3, %v2128_v25, 0.0  ;;  %v1331_v31 = vmul.f32 %v2128_v25, %v2128_v25  ;;  %v1939_v1 = vpack.c.bf16 %v2128_v25, %v2128_v25 }
 0x137   : > { %v1378_v34 = vadd.f32 %v1377_v24, %v1376_v0  ;;  %v1279_v35 = vadd.f32 %v1278_v30, %v1277_v27  ;;  %v1280_v2 = vsel %vm1244_vm3, %v2125_v5, 0.0  ;;  %v1333_v39 = vmul.f32 %v2127_v22, %v2127_v22  ;;  %1567 = vst.msk [vmem:[%s2583_s21 + $0x4c] sm:$0xf] %vm1547_vm2, %v1941_v29 }
 0x138   : > { %v2063_v28 = vpop.f32.mrb[20].mxu1  ;;  %v2097_v32 = vpop.f32.mrb[20].mxu0  ;;  %v1379_v40 = vsel %vm1244_vm3, %v1331_v31, 0.0  ;;  %1565 = vst.msk [vmem:[%s2583_s21 + $0x44] sm:$0xf] %vm1547_vm2, %v1939_v1  ;;  %v1381_v44 = vsel %vm1244_vm3, %v1332_v26, 0.0 }
 0x139   : > { %v829_v33 = vpop.f32.mrb[21].mxu1  ;;  %v2129_v36 = vadd.f32 %v2097_v32, %v2063_v28  ;;  %v1165_v37 = vpop.f32.mrb[21].mxu0  ;;  %v1282_v3 = vsel %vm1244_vm3, %v2127_v22, 0.0  ;;  %v1281_v45 = vadd.f32 %v1280_v2, %v1279_v35  ;;  %v1380_v46 = vadd.f32 %v1379_v40, %v1378_v34 }
 0x13a   : > { %v2064_v38 = vpop.f32.mrb[22].mxu1  ;;  %v2130_v41 = vadd.f32 %v1165_v37, %v829_v33  ;;  %v2098_v42 = vpop.f32.mrb[22].mxu0  ;;  %v1383_v55 = vsel %vm1244_vm3, %v1333_v39, 0.0 }
 0x13b   : > { %v832_v43 = vpop.f32.mrb[23].mxu1  ;;  %v1168_v47 = vpop.f32.mrb[23].mxu0  ;;  %v1944_v48 = vpack.c.bf16 %v2129_v36, %v2129_v36  ;;  %v1382_v52 = vadd.f32 %v1381_v44, %v1380_v46  ;;  %v1283_v53 = vadd.f32 %v1282_v3, %v1281_v45  ;;  %v2131_v54 = vadd.f32 %v2098_v42, %v2064_v38 }
 0x13c   : > { %v1284_v49 = vsel %vm1244_vm3, %v2130_v41, 0.0  ;;  %v1334_v50 = vmul.f32 %v2130_v41, %v2130_v41  ;;  %v1942_v51 = vpack.c.bf16 %v2130_v41, %v2130_v41  ;;  %v2132_v4 = vadd.f32 %v1168_v47, %v832_v43 }
 0x13d   : > { %1570 = vst.msk [vmem:[%s2583_s21 + $0x58] sm:$0xf] %vm1547_vm2, %v1944_v48  ;;  %v1336_v57 = vmul.f32 %v2129_v36, %v2129_v36  ;;  %v1285_v58 = vadd.f32 %v1284_v49, %v1283_v53  ;;  %v1384_v59 = vadd.f32 %v1383_v55, %v1382_v52  ;;  %v1945_v5 = vpack.c.bf16 %v2131_v54, %v2131_v54 }
 0x13e   : > { %v1385_v56 = vsel %vm1244_vm3, %v1334_v50, 0.0  ;;  %1568 = vst.msk [vmem:[%s2583_s21 + $0x50] sm:$0xf] %vm1547_vm2, %v1942_v51  ;;  %v1286_v61 = vsel %vm1244_vm3, %v2132_v4, 0.0  ;;  %v1335_v6 = vmul.f32 %v2132_v4, %v2132_v4  ;;  %v1943_v7 = vpack.c.bf16 %v2132_v4, %v2132_v4 }
 0x13f   : > { %v1386_v10 = vadd.f32 %v1385_v56, %v1384_v59  ;;  %v1287_v62 = vadd.f32 %v1286_v61, %v1285_v58  ;;  %v1288_v14 = vsel %vm1244_vm3, %v2129_v36, 0.0  ;;  %v1337_v15 = vmul.f32 %v2131_v54, %v2131_v54  ;;  %1571 = vst.msk [vmem:[%s2583_s21 + $0x5c] sm:$0xf] %vm1547_vm2, %v1945_v5 }
 0x140   : > { %v2067_v60 = vpop.f32.mrb[24].mxu1  ;;  %v2101_v8 = vpop.f32.mrb[24].mxu0  ;;  %v1387_v16 = vsel %vm1244_vm3, %v1335_v6, 0.0  ;;  %1569 = vst.msk [vmem:[%s2583_s21 + $0x54] sm:$0xf] %vm1547_vm2, %v1943_v7  ;;  %v1389_v19 = vsel %vm1244_vm3, %v1336_v57, 0.0 }
 0x141   : > { %v845_v9 = vpop.f32.mrb[25].mxu1  ;;  %v2133_v11 = vadd.f32 %v2101_v8, %v2067_v60  ;;  %v1181_v12 = vpop.f32.mrb[25].mxu0  ;;  %v1290_v20 = vsel %vm1244_vm3, %v2131_v54, 0.0  ;;  %v1289_v21 = vadd.f32 %v1288_v14, %v1287_v62  ;;  %v1388_v22 = vadd.f32 %v1387_v16, %v1386_v10 }
 0x142   : > { %v2068_v13 = vpop.f32.mrb[26].mxu1  ;;  %v2134_v17 = vadd.f32 %v1181_v12, %v845_v9  ;;  %v2102_v18 = vpop.f32.mrb[26].mxu0  ;;  %v1391_v30 = vsel %vm1244_vm3, %v1337_v15, 0.0 }
 0x143   : > { %v848_v63 = vpop.f32.mrb[27].mxu1  ;;  %v1184_v23 = vpop.f32.mrb[27].mxu0  ;;  %v1948_v24 = vpack.c.bf16 %v2133_v11, %v2133_v11  ;;  %v1390_v0 = vadd.f32 %v1389_v19, %v1388_v22  ;;  %v1291_v28 = vadd.f32 %v1290_v20, %v1289_v21  ;;  %v2135_v29 = vadd.f32 %v2102_v18, %v2068_v13 }
 0x144   : > { %v1292_v25 = vsel %vm1244_vm3, %v2134_v17, 0.0  ;;  %v1338_v26 = vmul.f32 %v2134_v17, %v2134_v17  ;;  %v1946_v27 = vpack.c.bf16 %v2134_v17, %v2134_v17  ;;  %v2136_v1 = vadd.f32 %v1184_v23, %v848_v63 }
 0x145   : > { %1574 = vst.msk [vmem:[%s2583_s21 + $0x68] sm:$0xf] %vm1547_vm2, %v1948_v24  ;;  %v1340_v32 = vmul.f32 %v2133_v11, %v2133_v11  ;;  %v1293_v33 = vadd.f32 %v1292_v25, %v1291_v28  ;;  %v1392_v34 = vadd.f32 %v1391_v30, %v1390_v0  ;;  %v1949_v36 = vpack.c.bf16 %v2135_v29, %v2135_v29 }
 0x146   : > { %v1393_v31 = vsel %vm1244_vm3, %v1338_v26, 0.0  ;;  %1572 = vst.msk [vmem:[%s2583_s21 + $0x60] sm:$0xf] %vm1547_vm2, %v1946_v27  ;;  %v1294_v37 = vsel %vm1244_vm3, %v2136_v1, 0.0  ;;  %v1339_v38 = vmul.f32 %v2136_v1, %v2136_v1  ;;  %v1947_v2 = vpack.c.bf16 %v2136_v1, %v2136_v1 }
 0x147   : > { %v1394_v41 = vadd.f32 %v1393_v31, %v1392_v34  ;;  %v1295_v42 = vadd.f32 %v1294_v37, %v1293_v33  ;;  %v1296_v45 = vsel %vm1244_vm3, %v2133_v11, 0.0  ;;  %v1341_v46 = vmul.f32 %v2135_v29, %v2135_v29  ;;  %1575 = vst.msk [vmem:[%s2583_s21 + $0x6c] sm:$0xf] %vm1547_vm2, %v1949_v36 }
 0x148   : > { %v2071_v35 = vpop.f32.mrb[28].mxu1  ;;  %v2105_v39 = vpop.f32.mrb[28].mxu0  ;;  %v1395_v47 = vsel %vm1244_vm3, %v1339_v38, 0.0  ;;  %1573 = vst.msk [vmem:[%s2583_s21 + $0x64] sm:$0xf] %vm1547_vm2, %v1947_v2  ;;  %v1397_v51 = vsel %vm1244_vm3, %v1340_v32, 0.0 }
 0x149   : > { %v861_v40 = vpop.f32.mrb[29].mxu1  ;;  %v2137_v43 = vadd.f32 %v2105_v39, %v2071_v35  ;;  %v1197_v44 = vpop.f32.mrb[29].mxu0  ;;  %v1298_v52 = vsel %vm1244_vm3, %v2135_v29, 0.0  ;;  %v1297_v53 = vadd.f32 %v1296_v45, %v1295_v42  ;;  %v1396_v54 = vadd.f32 %v1395_v47, %v1394_v41 }
 0x14a   : > { %v2072_v3 = vpop.f32.mrb[30].mxu1  ;;  %v2138_v48 = vadd.f32 %v1197_v44, %v861_v40  ;;  %v2106_v49 = vpop.f32.mrb[30].mxu0  ;;  %v1399_v61 = vsel %vm1244_vm3, %v1341_v46, 0.0 }
 0x14b   : > { %v864_v50 = vpop.f32.mrb[31].mxu1  ;;  %v1200_v55 = vpop.f32.mrb[31].mxu0  ;;  %v1952_v56 = vpack.c.bf16 %v2137_v43, %v2137_v43  ;;  %v1398_v59 = vadd.f32 %v1397_v51, %v1396_v54  ;;  %v1299_v60 = vadd.f32 %v1298_v52, %v1297_v53  ;;  %v2139_v5 = vadd.f32 %v2106_v49, %v2072_v3 }
 0x14c   : > { %v1300_v4 = vsel %vm1244_vm3, %v2138_v48, 0.0  ;;  %v1342_v57 = vmul.f32 %v2138_v48, %v2138_v48  ;;  %v1950_v58 = vpack.c.bf16 %v2138_v48, %v2138_v48  ;;  %v2140_v7 = vadd.f32 %v1200_v55, %v864_v50 }
 0x14d   : > { %1578 = vst.msk [vmem:[%s2583_s21 + $0x78] sm:$0xf] %vm1547_vm2, %v1952_v56  ;;  %v1344_v8 = vmul.f32 %v2137_v43, %v2137_v43  ;;  %v1301_v9 = vadd.f32 %v1300_v4, %v1299_v60  ;;  %v1400_v10 = vadd.f32 %v1399_v61, %v1398_v59  ;;  %v1953_v62 = vpack.c.bf16 %v2139_v5, %v2139_v5 }
 0x14e   : > { %v1401_v6 = vsel %vm1244_vm3, %v1342_v57, 0.0  ;;  %1576 = vst.msk [vmem:[%s2583_s21 + $0x70] sm:$0xf] %vm1547_vm2, %v1950_v58  ;;  %v1302_v11 = vsel %vm1244_vm3, %v2140_v7, 0.0  ;;  %v1343_v12 = vmul.f32 %v2140_v7, %v2140_v7  ;;  %v1951_v13 = vpack.c.bf16 %v2140_v7, %v2140_v7 }
 0x14f   : > { %v1402_v14 = vadd.f32 %v1401_v6, %v1400_v10  ;;  %v1303_v15 = vadd.f32 %v1302_v11, %v1301_v9  ;;  %v1304_v16 = vsel %vm1244_vm3, %v2137_v43, 0.0  ;;  %v1345_v17 = vmul.f32 %v2139_v5, %v2139_v5  ;;  %1579 = vst.msk [vmem:[%s2583_s21 + $0x7c] sm:$0xf] %vm1547_vm2, %v1953_v62 }
 0x150   : > { %v1403_v18 = vsel %vm1244_vm3, %v1343_v12, 0.0  ;;  %1577 = vst.msk [vmem:[%s2583_s21 + $0x74] sm:$0xf] %vm1547_vm2, %v1951_v13  ;;  %v1405_v20 = vsel %vm1244_vm3, %v1344_v8, 0.0  ;;  %v1306_v21 = vsel %vm1244_vm3, %v2139_v5, 0.0 }
 0x151   : > { %v1305_v63 = vadd.f32 %v1304_v16, %v1303_v15  ;;  %v1404_v19 = vadd.f32 %v1403_v18, %v1402_v14  ;;  %v1407_v24 = vsel %vm1244_vm3, %v1345_v17, 0.0 }
 0x153   : > { %v1307_v22 = vadd.f32 %v1306_v21, %v1305_v63  ;;  %v1406_v23 = vadd.f32 %v1405_v20, %v1404_v19 }
 0x155   : > { %v1308_v25 = vrot.slane %v1307_v22, 4  ;;  %v1408_v26 = vadd.f32 %v1407_v24, %v1406_v23 }
 0x157   : > { %v1309_v27 = vadd.f32 %v1308_v25, %v1307_v22  ;;  %v1409_v0 = vrot.slane %v1408_v26, 4 }
 0x159   : > { %v1310_v28 = vrot.slane %v1309_v27, 2  ;;  %v1410_v29 = vadd.f32 %v1409_v0, %v1408_v26 }
 0x15b   : > { %v1311_v30 = vadd.f32 %v1310_v28, %v1309_v27  ;;  %v1411_v31 = vrot.slane %v1410_v29, 2 }
 0x15d   : > { %v1312_v1 = vrot.slane %v1311_v30, 1  ;;  %v1412_v32 = vadd.f32 %v1411_v31, %v1410_v29 }
 0x15f   : > { %v1413_v33 = vrot.slane %v1412_v32, 1  ;;  %v1313_v34 = vadd.f32 %v1312_v1, %v1311_v30 }
 0x161   : > { %v1414_v35 = vadd.f32 %v1413_v33, %v1412_v32 }
 0x163   : > { %v1416_v36 = vsel %vm1415_vm4, %v1313_v34, %v1414_v35 }
 0x164   : > { %1418 = vst.msk [vmem:[%s188_s27] sm:$0x3] %vm1417_vm5, %v1416_v36 }
 0x165   : > { %2297 = shalt.err (!%p2294_p6)
}
 0x166   : > { %s2298_s10 = scalar_lea.hbm %s2726_s4, 32  ;;  %s2302_s15 = scalar_lea.hbm %s2776_s3, 64 }
 0x167   : > { %p2299_p7 = scmp.ne.s32.totalorder %s2726_s4, %s2298_s10  ;;  %p2303_p11 = scmp.lt.u32.totalorder %s2726_s4, %s2776_s3 }
 0x168   : > { %p2304_p12 = scmp.lt.u32.totalorder %s2302_s15, %s2298_s10  ;;  %p2306_p0 = scmp.lt.u32.totalorder %s2298_s10, %s2726_s4 }
 0x169   : > { %p2300_p9 = pnand %p2299_p7, %p2425_p4 }
 0x16a   : > { %p2305_p13 = por %p2304_p12, %p2303_p11 }
 0x16b   : > { %p2301_p10 = pneg %p2300_p9 }
 0x16c   : > { %p2307_p1 = por %p2306_p0, %p2305_p13 }
 0x16e   : > { %p2308_p2 = pnand %p2307_p1, %p2301_p10 }
 0x170   : > { %2311 = shalt.err (!%p2308_p2)
}
 0x171   : > { %2178 = dma.vmem_to_hbm [thread:$0]  (%p2425_p4), %s2728_s28, 32, %s2726_s4, %s1587_s5  }
 0x172 PF: > { %p2184_p3 = scmp.ge.s32.totalorder %s2362_s17, 2  ;;  %s1627_s23 = sand.u32 1, %s2342_s12  }
 0x173   : > { %s1628_s26 = scalar_lea.sflag [#allocation3], %s1627_s23 }
 0x174   : > { %p2181_p5 = pnand %p2184_p3, %p2432_p8 }
 0x176   : > { %2337 = dma.done.wait (!%p2181_p5), %s1628_s26, 32  }
 0x177   : > { %2339 = vsyncadd (!%p2181_p5), %s1628_s26, 4294967264  ;;  %s17_s17 = sadd.s32 1, %s2362_s17   ;;  %s2779_s12 = smov %s2346_s13 }
 0x178   : > { %p14_p6 = scmp.ge.s32.totalorder %s17_s17, 4   ;;  %s2780_s13 = smov %s2350_s14 }
 0x179   : > { %s2781_s14 = smov %s2438_s25  ;;  %s2782_s15 = smov %s2358_s16 }
 0x17a   : > { %s2783_s16 = smov %s2785_s20  ;;  %16 = sbr.rel (!%p14_p6) target bundleno = 4 (0x4), region = 80 }
 0x181   :  { %1633 = vsyncpa [#allocation3], 1 }
 0x182   :  { %1635 = vsyncpa [#allocation3 + $0x1], 1 }

</bundles_post_ra>
